<compile_context>
chip_gen: v7x
topology: tpu7x:2x2x1
jax: 0.10.0
libtpu: 0.0.40
codegen_flags: <defaults>
</compile_context>

<pallas_src>
import jax
import jax.numpy as jnp
from jax.experimental import pallas as pl
from jax.experimental.pallas import tpu as pltpu


def _round_up(x, m):
    return ((x + m - 1) // m) * m


def _net_kernel(v_ref, q_ref, wv_ref, wq_ref, b_ref, o_ref):
    # Cast activation tiles to the (narrow) weight dtype in-VMEM: keeps the MXU
    # at native bf16 rate without paying a separate HBM convert pass upstream.
    cdt = wv_ref.dtype
    acc = jnp.dot(v_ref[...].astype(cdt), wv_ref[...],
                  preferred_element_type=jnp.float32)
    acc = acc + jnp.dot(q_ref[...].astype(cdt), wq_ref[...],
                        preferred_element_type=jnp.float32)
    o_ref[...] = (acc + b_ref[...]).astype(o_ref.dtype)


def prepare_net_params(wv, bv, wq, bq, *, compute_dtype=jnp.bfloat16):
    """One-time parameter prep (do NOT redo this every forward call).

    PyTorch nn.Linear stores W as (out, in); the kernel wants (in, out) so both
    matmuls map straight onto the MXU.  The two biases are pre-summed into one
    f32 row added after f32 accumulation.  Pass compute_dtype=jnp.float32 for
    exact f32 parity with PyTorch; the default bf16 halves weight traffic and
    only changes numerics at the bf16-rounding level (f32 accumulation kept).
    """
    wv_t = wv.T.astype(compute_dtype)                                        # (Dv, Da)
    wq_t = wq.T.astype(compute_dtype)                                        # (Dq, Da)
    bias = (bv.astype(jnp.float32) + bq.astype(jnp.float32)).reshape(1, -1)  # (1, Da)
    return wv_t, wq_t, bias


def _choose_tile_b(B):
    # 1024-2048 row tiles sit near the HBM roofline (per-step grid overhead
    # ~0.35us becomes negligible) while staying well inside v7x's 64 MiB VMEM.
    # For large batches keep an EVEN number of "parallel" steps so the batch
    # axis load-balances across both v7x TensorCores.
    if B < 2048:
        return _round_up(B, 8)                 # single tile
    n = max(2, pl.cdiv(B, 2048))
    if n % 2:
        n += 1                                 # even step count -> both TCs busy
    return _round_up(pl.cdiv(B, n), 8)


def _build_call(B, tile_b, Dv, Dq, Da, in_dtype, w_dtype, out_dtype):
    n_tiles = pl.cdiv(B, tile_b)

    # Grid-invariant weights / fused bias need only ONE VMEM buffer; version-
    # gate on the pipeline_mode feature instead of a broad try/except.
    if hasattr(pl, "Buffered"):
        resident = dict(pipeline_mode=pl.Buffered(1))
        n_wbuf = 1
    else:
        resident = {}
        n_wbuf = 2

    in_b = jnp.dtype(in_dtype).itemsize
    w_b = jnp.dtype(w_dtype).itemsize
    out_b = jnp.dtype(out_dtype).itemsize

    # VMEM budget: double-buffered activation/output tiles + resident weights
    # + headroom, capped at 32 MiB so the same config fits v7x (64 MiB
    # physical) and v5e defaults without starving the rest of the program.
    needed = (2 * tile_b * (Dv + Dq) * in_b          # double-buffered act tiles
              + 2 * tile_b * Da * out_b              # double-buffered out tiles
              + n_wbuf * ((Dv + Dq) * Da * w_b + Da * 4))
    vmem_limit = int(min(32 << 20, max(needed + (4 << 20), 8 << 20)))

    flops = 2 * B * (Dv + Dq) * Da + B * Da
    bytes_accessed = (B * (Dv + Dq) * in_b            # activations (read once)
                      + (Dv + Dq) * Da * w_b + Da * 4  # weights + bias
                      + B * Da * out_b)                # output

    return pl.pallas_call(
        _net_kernel,
        out_shape=jax.ShapeDtypeStruct((B, Da), out_dtype),
        grid_spec=pltpu.PrefetchScalarGridSpec(
            num_scalar_prefetch=0,
            grid=(n_tiles,),
            in_specs=[
                pl.BlockSpec((tile_b, Dv), lambda i: (i, 0)),            # v tile (f32)
                pl.BlockSpec((tile_b, Dq), lambda i: (i, 0)),            # q tile (f32)
                pl.BlockSpec((Dv, Da), lambda i: (0, 0), **resident),    # Wv^T resident
                pl.BlockSpec((Dq, Da), lambda i: (0, 0), **resident),    # Wq^T resident
                pl.BlockSpec((1, Da), lambda i: (0, 0), **resident),     # fused f32 bias
            ],
            out_specs=pl.BlockSpec((tile_b, Da), lambda i: (i, 0)),
        ),
        compiler_params=pltpu.CompilerParams(
            dimension_semantics=("parallel",),
            vmem_limit_bytes=vmem_limit,
        ),
        cost_estimate=pl.CostEstimate(
            flops=flops, transcendentals=0, bytes_accessed=bytes_accessed),
    )


def net_forward(v, q, wv_t, wq_t, bias, *, tile_b=None, out_dtype=jnp.float32):
    """v: (B, Dv), q: (B, Dq); wv_t: (Dv, Da), wq_t: (Dq, Da), bias: (1, Da).

    Params must come from prepare_net_params.  Matches nn.Linear semantics;
    output is f32 by default (PyTorch parity) regardless of input dtype.
    Ragged batches are handled by Pallas's clipped/masked tail tile (rows are
    independent), so no padded copies of the inputs or output slicing occur.
    """
    B, Dv = v.shape
    Bq, Dq = q.shape
    assert B == Bq, "v and q must share the batch dimension"
    assert wv_t.shape[0] == Dv and wq_t.shape[0] == Dq
    Da = wv_t.shape[1]

    if tile_b is None:
        tile_b = _choose_tile_b(B)
    else:
        tile_b = _round_up(tile_b, 8)
    tile_b = max(8, min(tile_b, _round_up(B, 8)))

    call = _build_call(B, tile_b, Dv, Dq, Da, v.dtype, wv_t.dtype, out_dtype)
    return call(v, q, wv_t, wq_t, bias)


if __name__ == "__main__":
    # Small shapes consistent with Net(img_vect_size, question_vect_size, answer_vect_size).
    B = 8
    img_vect_size = 256
    question_vect_size = 128
    answer_vect_size = 128

    key = jax.random.PRNGKey(0)
    kv, kq, kwv, kbv, kwq, kbq = jax.random.split(key, 6)

    v = jax.random.normal(kv, (B, img_vect_size), dtype=jnp.float32)
    q = jax.random.normal(kq, (B, question_vect_size), dtype=jnp.float32)

    # PyTorch nn.Linear parameter shapes: W is (out, in), b is (out,).
    wv = jax.random.normal(kwv, (answer_vect_size, img_vect_size), dtype=jnp.float32) * 0.02
    bv = jax.random.normal(kbv, (answer_vect_size,), dtype=jnp.float32) * 0.02
    wq = jax.random.normal(kwq, (answer_vect_size, question_vect_size), dtype=jnp.float32) * 0.02
    bq = jax.random.normal(kbq, (answer_vect_size,), dtype=jnp.float32) * 0.02

    # One-time parameter prep (transpose + bf16 cast + bias fusion).
    wv_t, wq_t, bias = prepare_net_params(wv, bv, wq, bq)

    out = jax.block_until_ready(net_forward(v, q, wv_t, wq_t, bias))

    # Reference (full f32, same math as PyTorch forward); loose tol for bf16 weights.
    ref = v @ wv.T + bv + q @ wq.T + bq
    assert out.shape == (B, answer_vect_size)
    assert out.dtype == jnp.float32
    assert jnp.allclose(out, ref, atol=2e-2, rtol=2e-2), "mismatch vs reference"

    print("KERNEL_OK")
</pallas_src>

<mosaic_0001>
module attributes {stable_mosaic.version = 11 : i64} {
  func.func @_net_kernel(%arg0: i32, %arg1: memref<8x256xf32, #tpu.memory_space<vmem>>, %arg2: memref<8x128xf32, #tpu.memory_space<vmem>>, %arg3: memref<256x128xbf16, #tpu.memory_space<vmem>>, %arg4: memref<128x128xbf16, #tpu.memory_space<vmem>>, %arg5: memref<1x128xf32, #tpu.memory_space<vmem>>, %arg6: memref<8x128xf32, #tpu.memory_space<vmem>>) attributes {dimension_semantics = [#tpu.dimension_semantics<parallel>], iteration_bounds = array<i64: 1>, scalar_prefetch = 0 : i64, scratch_operands = 0 : i64, tpu.core_type = #tpu.core_type<tc>, window_params = [{transform_indices = @transform_0, window_bounds = array<i64: 8, 256>}, {transform_indices = @transform_1, window_bounds = array<i64: 8, 128>}, {pipeline_mode = #tpu.pipeline_mode<synchronous>, transform_indices = @transform_2, window_bounds = array<i64: 256, 128>}, {pipeline_mode = #tpu.pipeline_mode<synchronous>, transform_indices = @transform_3, window_bounds = array<i64: 128, 128>}, {pipeline_mode = #tpu.pipeline_mode<synchronous>, transform_indices = @transform_4, window_bounds = array<i64: 1, 128>}, {transform_indices = @transform_5, window_bounds = array<i64: 8, 128>}]} {
    %c0 = arith.constant 0 : index
    %c0_0 = arith.constant 0 : index
    %0 = vector.load %arg1[%c0, %c0_0] : memref<8x256xf32, #tpu.memory_space<vmem>>, vector<8x256xf32>
    %1 = arith.truncf %0 : vector<8x256xf32> to vector<8x256xbf16>
    %c0_1 = arith.constant 0 : index
    %c0_2 = arith.constant 0 : index
    %2 = vector.load %arg3[%c0_1, %c0_2] : memref<256x128xbf16, #tpu.memory_space<vmem>>, vector<256x128xbf16>
    %cst = arith.constant dense<0.000000e+00> : vector<8x128xf32>
    %3 = tpu.matmul %1, %2, %cst {dimension_numbers = #tpu.dot_dimension_numbers<[1], [0], [0], [1], [0, 0, 1, 1], [], []>} : vector<8x256xbf16>, vector<256x128xbf16>, vector<8x128xf32> -> vector<8x128xf32>
    %c0_3 = arith.constant 0 : index
    %c0_4 = arith.constant 0 : index
    %4 = vector.load %arg2[%c0_3, %c0_4] : memref<8x128xf32, #tpu.memory_space<vmem>>, vector<8x128xf32>
    %5 = arith.truncf %4 : vector<8x128xf32> to vector<8x128xbf16>
    %c0_5 = arith.constant 0 : index
    %c0_6 = arith.constant 0 : index
    %6 = vector.load %arg4[%c0_5, %c0_6] : memref<128x128xbf16, #tpu.memory_space<vmem>>, vector<128x128xbf16>
    %cst_7 = arith.constant dense<0.000000e+00> : vector<8x128xf32>
    %7 = tpu.matmul %5, %6, %cst_7 {dimension_numbers = #tpu.dot_dimension_numbers<[1], [0], [0], [1], [0, 0, 1, 1], [], []>} : vector<8x128xbf16>, vector<128x128xbf16>, vector<8x128xf32> -> vector<8x128xf32>
    %8 = arith.addf %3, %7 : vector<8x128xf32>
    %c0_8 = arith.constant 0 : index
    %c0_9 = arith.constant 0 : index
    %9 = vector.load %arg5[%c0_8, %c0_9] : memref<1x128xf32, #tpu.memory_space<vmem>>, vector<1x128xf32>
    %10 = vector.broadcast %9 : vector<1x128xf32> to vector<8x128xf32>
    %11 = arith.addf %8, %10 : vector<8x128xf32>
    %c0_10 = arith.constant 0 : index
    %c0_11 = arith.constant 0 : index
    %12 = vector.load %arg6[%c0_10, %c0_11] : memref<8x128xf32, #tpu.memory_space<vmem>>, vector<8x128xf32>
    tpu.vector_store %arg6[%c0_10, %c0_11], %11 {strides = array<i32>} : memref<8x128xf32, #tpu.memory_space<vmem>>, vector<8x128xf32>,
    return
  }
  func.func @transform_0(%arg0: i32) -> (i32, i32) {
    %c0_i32 = arith.constant 0 : i32
    %c0_i32_0 = arith.constant 0 : i32
    return %arg0, %c0_i32 : i32, i32
  }
  func.func @transform_1(%arg0: i32) -> (i32, i32) {
    %c0_i32 = arith.constant 0 : i32
    %c0_i32_0 = arith.constant 0 : i32
    return %arg0, %c0_i32 : i32, i32
  }
  func.func @transform_2(%arg0: i32) -> (i32, i32) {
    %c0_i32 = arith.constant 0 : i32
    %c0_i32_0 = arith.constant 0 : i32
    %c0_i32_1 = arith.constant 0 : i32
    return %c0_i32, %c0_i32_0 : i32, i32
  }
  func.func @transform_3(%arg0: i32) -> (i32, i32) {
    %c0_i32 = arith.constant 0 : i32
    %c0_i32_0 = arith.constant 0 : i32
    %c0_i32_1 = arith.constant 0 : i32
    return %c0_i32, %c0_i32_0 : i32, i32
  }
  func.func @transform_4(%arg0: i32) -> (i32, i32) {
    %c0_i32 = arith.constant 0 : i32
    %c0_i32_0 = arith.constant 0 : i32
    %c0_i32_1 = arith.constant 0 : i32
    return %c0_i32, %c0_i32_0 : i32, i32
  }
  func.func @transform_5(%arg0: i32) -> (i32, i32) {
    %c0_i32 = arith.constant 0 : i32
    %c0_i32_0 = arith.constant 0 : i32
    return %arg0, %c0_i32 : i32, i32
  }
}

</mosaic_0001>

<bundles_post_ra>
// kernel: tpu_custom_call.1
= control target key start
LH: loop header
LB: loop body
LE: loop exit
PB: predicated region body
PF: predicated region fallthrough
CT: control target
= control target key end

     0   :  { %10 = vsyncpa [#allocation3], 0  ;;  %s706_s0 = inlined_call_operand.hbm [shape: f32[8,256], index: 0, kind: input, shape index: {}]   ;;  %s707_s1 = inlined_call_operand.hbm [shape: f32[8,128], index: 1, kind: input, shape index: {}]   ;;  %s708_s2 = inlined_call_operand.hbm [shape: bf16[256,128], index: 2, kind: input, shape index: {}]   ;;  %s709_s3 = inlined_call_operand.hbm [shape: bf16[128,128], index: 3, kind: input, shape index: {}]   ;;  %s710_s4 = inlined_call_operand.vmem [shape: f32[1,128], index: 4, kind: input, shape index: {}]   ;;  %s711_s5 = inlined_call_operand.hbm [shape: f32[8,128], index: 5, kind: output, shape index: {}]  }
   0x1   :  { %11 = vsyncpa [#allocation6], 0 }
   0x2   :  { %12 = vsyncpa [#allocation9], 0 }
   0x3   :  { %13 = vsyncpa [#allocation4], 0  ;;  %s604_s18 = smov [#allocation5]   ;;  %s605_s20 = smov [#allocation2]  }
   0x4   :  { %s30_s19 = sshll.u32 %s604_s18, 4  ;;  %s20_s21 = sshll.u32 %s605_s20, 4  ;;  %s31_s19 = int_to_ptr.vmem [resolvable:$true] %s30_s19  ;;  %s21_s21 = int_to_ptr.vmem [resolvable:$true] %s20_s21 }
   0x5   :  { %s486_s24 = scalar_lea.hbm %s707_s1, 128 }
   0x6   :  { %p487_p0 = scmp.ne.s32.totalorder %s707_s1, %s486_s24  ;;  %p490_p1 = scmp.lt.u32.totalorder %s486_s24, %s707_s1 }
   0x8   :  { %p492_p2 = pnand %p490_p1, %p487_p0 }
   0xa   :  { %495 = shalt.err (!%p492_p2)
}
   0xb   :  { %s496_s29 = scalar_lea.vmem %s31_s19, 128  ;;  %p501_p4 = scmp.lt.s32.totalorder %s31_s19, %s31_s19 }
   0xc   :  { %p497_p3 = scmp.ne.s32.totalorder %s31_s19, %s496_s29  ;;  %p502_p5 = scmp.lt.s32.totalorder %s496_s29, %s496_s29 }
   0xe   :  { %p503_p6 = por %p502_p5, %p501_p4 }
  0x10   :  { %p504_p7 = pnand %p503_p6, %p497_p3 }
  0x12   :  { %507 = shalt.err (!%p504_p7)
}
  0x13   :  { %33 = dma.hbm_to_vmem [thread:$0]  %s707_s1, 128, %s31_s19, [#allocation6]  }
  0x14   :  { %s508_s9 = scalar_lea.hbm %s706_s0, 256 }
  0x15   :  { %p509_p8 = scmp.ne.s32.totalorder %s706_s0, %s508_s9  ;;  %p512_p9 = scmp.lt.u32.totalorder %s508_s9, %s706_s0 }
  0x17   :  { %p514_p10 = pnand %p512_p9, %p509_p8 }
  0x19   :  { %517 = shalt.err (!%p514_p10)
}
  0x1a   :  { %s518_s14 = scalar_lea.vmem %s21_s21, 256  ;;  %p523_p12 = scmp.lt.s32.totalorder %s21_s21, %s21_s21 }
  0x1b   :  { %p519_p11 = scmp.ne.s32.totalorder %s21_s21, %s518_s14  ;;  %p524_p13 = scmp.lt.s32.totalorder %s518_s14, %s518_s14 }
  0x1d   :  { %p525_p0 = por %p524_p13, %p523_p12 }
  0x1f   :  { %p526_p1 = pnand %p525_p0, %p519_p11 }
  0x21   :  { %529 = shalt.err (!%p526_p1)
}
  0x22   :  { %23 = dma.hbm_to_vmem [thread:$0]  %s706_s0, 256, %s21_s21, [#allocation3]  }
  0x23   :  { %s606_s16 = smov [#allocation7]   ;;  %s530_s20 = scalar_lea.hbm %s708_s2, 2048 }
  0x24   :  { %s39_s17 = sshll.u32 %s606_s16, 4  ;;  %p531_p2 = scmp.ne.s32.totalorder %s708_s2, %s530_s20  ;;  %s40_s17 = int_to_ptr.vmem [resolvable:$true] %s39_s17 }
  0x25   :  { %p534_p3 = scmp.lt.u32.totalorder %s530_s20, %s708_s2 }
  0x27   :  { %p536_p4 = pnand %p534_p3, %p531_p2 }
  0x29   :  { %539 = shalt.err (!%p536_p4)
}
  0x2a   :  { %s540_s26 = scalar_lea.vmem %s40_s17, 2048  ;;  %p545_p6 = scmp.lt.s32.totalorder %s40_s17, %s40_s17 }
  0x2b   :  { %p541_p5 = scmp.ne.s32.totalorder %s40_s17, %s540_s26  ;;  %p546_p7 = scmp.lt.s32.totalorder %s540_s26, %s540_s26 }
  0x2d   :  { %p547_p8 = por %p546_p7, %p545_p6 }
  0x2f   :  { %p548_p9 = pnand %p547_p8, %p541_p5 }
  0x31   :  { %551 = shalt.err (!%p548_p9)
}
  0x32   :  { %s607_s0 = smov 64   ;;  %s608_s21 = smov 4  }
  0x33   :  { %45 = dma.hbm_to_vmem [thread:$0]  %s708_s2, 2048, %s40_s17, [#allocation6], %s607_s0, %s607_s0, %s608_s21  }
  0x34   :  { %s609_s29 = smov [#allocation8]   ;;  %s552_s8 = scalar_lea.hbm %s709_s3, 1024 }
  0x35   :  { %s51_s30 = sshll.u32 %s609_s29, 4  ;;  %p553_p10 = scmp.ne.s32.totalorder %s709_s3, %s552_s8  ;;  %s52_s30 = int_to_ptr.vmem [resolvable:$true] %s51_s30 }
  0x36   :  { %p556_p11 = scmp.lt.u32.totalorder %s552_s8, %s709_s3 }
  0x38   :  { %p558_p12 = pnand %p556_p11, %p553_p10 }
  0x3a   :  { %561 = shalt.err (!%p558_p12)
}
  0x3b   :  { %s562_s13 = scalar_lea.vmem %s52_s30, 1024  ;;  %p567_p0 = scmp.lt.s32.totalorder %s52_s30, %s52_s30 }
  0x3c   :  { %p563_p13 = scmp.ne.s32.totalorder %s52_s30, %s562_s13  ;;  %p568_p1 = scmp.lt.s32.totalorder %s562_s13, %s562_s13 }
  0x3e   :  { %p569_p2 = por %p568_p1, %p567_p0 }
  0x40   :  { %p570_p3 = pnand %p569_p2, %p563_p13 }
  0x42   :  { %573 = shalt.err (!%p570_p3)
}
  0x43   :  { %57 = dma.hbm_to_vmem [thread:$0]  %s709_s3, 1024, %s52_s30, [#allocation9], %s607_s0, %s607_s0, %s608_s21  }
  0x44   :  { %596 = dma.done.wait [#allocation3], 256  }
  0x45   :  { %597 = vsyncadd [#allocation3], 4294967040 }
  0x46   :  { %598 = dma.done.wait [#allocation6], 2176  }
  0x47   :  { %599 = vsyncadd [#allocation6], 4294965120 }
  0x48   :  { %600 = dma.done.wait [#allocation9], 1024  }
  0x49   :  { %601 = vsyncadd [#allocation9], 4294966272  ;;  %v610_v0 = vmov 0.0   ;;  %vm611_vm0 = vmmov 0   ;;  %v462_v1 = vld [vmem:[#allocation7 + $0x40] sm:$0xff]   ;;  %v465_v4 = vld [vmem:[#allocation7 + $0x48] sm:$0xff]  }
  0x4a   :  { %433 = vmatprep.subr.bf16.mxu0 %v610_v0  ;;  %449 = vmatprep.mubr.msk.bf16.mxu0 %vm611_vm0, %v610_v0  ;;  %v463_v2 = vld [vmem:[#allocation8] sm:$0xff]   ;;  %v466_v5 = vld [vmem:[#allocation8 + $0x8] sm:$0xff]   ;;  %v468_v7 = vld [vmem:[#allocation7 + $0x50] sm:$0xff]   ;;  %s612_s15 = smov [#allocation10]  }
  0x4b   :  { %411 = vmatprep.subr.bf16.mxu1 %v462_v1  ;;  %v464_v3 = vld [vmem:[#allocation7] sm:$0xff]   ;;  %434 = vmatpush3.bf16.msra.mxu0 %v463_v2  ;;  %v467_v6 = vld [vmem:[#allocation7 + $0x8] sm:$0xff]   ;;  %v469_v8 = vld [vmem:[#allocation8 + $0x10] sm:$0xff]   ;;  %s366_s16 = sshll.u32 %s612_s15, 4  ;;  %s367_s16 = int_to_ptr.vmem [resolvable:$true] %s366_s16 }
  0x4c   :  { %412 = vmatpush3.bf16.msra.mxu1 %v464_v3  ;;  %435 = vmatprep.subr.bf16.mxu0 %v610_v0  ;;  %v470_v9 = vld [vmem:[#allocation7 + $0x10] sm:$0xff]   ;;  %v471_v10 = vld [vmem:[#allocation7 + $0x58] sm:$0xff]   ;;  %v474_v13 = vld [vmem:[#allocation7 + $0x60] sm:$0xff]   ;;  %s574_s17 = scalar_lea.vmem %s367_s16, 128  ;;  %p579_p5 = scmp.lt.s32.totalorder %s367_s16, %s367_s16 }
  0x4d   :  { %413 = vmatprep.subr.bf16.mxu1 %v465_v4  ;;  %v472_v11 = vld [vmem:[#allocation8 + $0x18] sm:$0xff]   ;;  %v475_v14 = vld [vmem:[#allocation8 + $0x20] sm:$0xff]   ;;  %v477_v16 = vld [vmem:[#allocation7 + $0x68] sm:$0xff]   ;;  %p575_p4 = scmp.ne.s32.totalorder %s367_s16, %s574_s17  ;;  %p580_p6 = scmp.lt.s32.totalorder %s574_s17, %s574_s17 }
  0x4e   :  { %v473_v12 = vld [vmem:[#allocation7 + $0x18] sm:$0xff]   ;;  %v476_v15 = vld [vmem:[#allocation7 + $0x20] sm:$0xff]   ;;  %v478_v17 = vld [vmem:[#allocation8 + $0x28] sm:$0xff]  }
  0x4f   :  { %436 = vmatpush3.bf16.msra.mxu0 %v466_v5  ;;  %v479_v18 = vld [vmem:[#allocation7 + $0x28] sm:$0xff]   ;;  %v480_v19 = vld [vmem:[#allocation7 + $0x70] sm:$0xff]   ;;  %v483_v23 = vld [vmem:[#allocation7 + $0x78] sm:$0xff]   ;;  %p581_p7 = por %p580_p6, %p579_p5 }
  0x50   :  { %414 = vmatpush3.bf16.msra.mxu1 %v467_v6  ;;  %437 = vmatprep.subr.bf16.mxu0 %v610_v0  ;;  %v481_v20 = vld [vmem:[#allocation8 + $0x30] sm:$0xff]   ;;  %v484_v25 = vld [vmem:[#allocation8 + $0x38] sm:$0xff]   ;;  %v73_v28 = vld [vmem:[#allocation2] sm:$0xff] }
  0x51   :  { %415 = vmatprep.subr.bf16.mxu1 %v468_v7  ;;  %v482_v21 = vld [vmem:[#allocation7 + $0x30] sm:$0xff]   ;;  %v109_v26 = vld [vmem:[#allocation5] sm:$0xff]  ;;  %v75_v30 = vpack.c.bf16 %v73_v28, %v73_v28  ;;  %v401_v40 = vld [vmem:[%s710_s4] ss:$0 sm:$0xff]  ;;  %p582_p8 = pnand %p581_p7, %p575_p4 }
  0x52   :  { %v74_v22 = vld [vmem:[#allocation2 + $0x8] sm:$0xff]  ;;  %v485_v27 = vld [vmem:[#allocation7 + $0x38] sm:$0xff]   ;;  %v110_v29 = vpack.c.bf16 %v109_v26, %v109_v26 }
  0x53   :  { %438 = vmatpush3.bf16.msra.mxu0 %v469_v8  ;;  %v76_v24 = vpack.c.bf16 %v74_v22, %v74_v22 }
  0x54   :  { %416 = vmatpush3.bf16.msra.mxu1 %v470_v9  ;;  %439 = vmatprep.subr.bf16.mxu0 %v610_v0 }
  0x55   :  { %417 = vmatprep.subr.bf16.mxu1 %v471_v10  ;;  %343 = vmatprep.mubr.bf16.mxu1 %v76_v24 }
  0x57   :  { %440 = vmatpush3.bf16.msra.mxu0 %v472_v11 }
  0x58   :  { %418 = vmatpush3.bf16.msra.mxu1 %v473_v12  ;;  %441 = vmatprep.subr.bf16.mxu0 %v610_v0 }
  0x59   :  { %419 = vmatprep.subr.bf16.mxu1 %v474_v13 }
  0x5b   :  { %442 = vmatpush3.bf16.msra.mxu0 %v475_v14 }
  0x5c   :  { %420 = vmatpush3.bf16.msra.mxu1 %v476_v15  ;;  %443 = vmatprep.subr.bf16.mxu0 %v610_v0 }
  0x5d   :  { %421 = vmatprep.subr.bf16.mxu1 %v477_v16 }
  0x5f   :  { %444 = vmatpush3.bf16.msra.mxu0 %v478_v17 }
  0x60   :  { %422 = vmatpush3.bf16.msra.mxu1 %v479_v18  ;;  %445 = vmatprep.subr.bf16.mxu0 %v610_v0 }
  0x61   :  { %423 = vmatprep.subr.bf16.mxu1 %v480_v19 }
  0x63   :  { %446 = vmatpush3.bf16.msra.mxu0 %v481_v20 }
  0x64   :  { %424 = vmatpush3.bf16.msra.mxu1 %v482_v21  ;;  %447 = vmatprep.subr.bf16.mxu0 %v610_v0 }
  0x65   :  { %425 = vmatprep.subr.bf16.mxu1 %v483_v23 }
  0x67   :  { %448 = vmatpush3.bf16.msra.mxu0 %v484_v25 }
  0x68   :  { %426 = vmatpush3.bf16.msra.mxu1 %v485_v27 }
  0x6a   :  { %450 = vmatmul.mubr.bf16.vlgmr.msra.gmra.mrb[0].mxu0 %v110_v29 }
  0x6b   :  { %344 = vmatmul.mubr.bf16.vlgmr.msra.gmra.mrb[0].mxu1 %v75_v30 }
 0x13d   :  { %v209_v31 = vpop.f32.mrb[0].mxu0 }
 0x13e   :  { %v427_v32 = vpop.f32.mrb[0].mxu1  ;;  %v451_v33 = vpop.f32.mrb[1].mxu0 }
 0x13f   :  { %v428_v34 = vpop.f32.mrb[1].mxu1  ;;  %v212_v35 = vpop.f32.mrb[2].mxu0 }
 0x140   :  { %v429_v36 = vadd.f32 %v428_v34, %v427_v32  ;;  %v430_v37 = vpop.f32.mrb[2].mxu1  ;;  %v452_v38 = vpop.f32.mrb[3].mxu0 }
 0x141   :  { %v431_v39 = vpop.f32.mrb[3].mxu1 }
 0x142   :  { %v346_v41 = vadd.f32 %v429_v36, %v209_v31 }
 0x144   :  { %v358_v42 = vadd.f32 %v401_v40, %v346_v41 }
 0x146   :  { %359 = vst [vmem:[#allocation10] sm:$0xff] %v358_v42 }
 0x147   :  { %585 = shalt.err (!%p582_p8)
}
 0x148   :  { %s586_s20 = scalar_lea.hbm %s711_s5, 128 }
 0x149   :  { %p587_p9 = scmp.ne.s32.totalorder %s711_s5, %s586_s20  ;;  %p590_p10 = scmp.lt.u32.totalorder %s586_s20, %s711_s5 }
 0x14b   :  { %p592_p11 = pnand %p590_p10, %p587_p9 }
 0x14d   :  { %595 = shalt.err (!%p592_p11)
}
 0x14e   :  { %369 = dma.vmem_to_hbm [thread:$0]  %s367_s16, 128, %s711_s5, [#allocation4]  }
 0x14f   :  { %602 = dma.done.wait [#allocation4], 128  }
 0x150   :  { %603 = vsyncadd [#allocation4], 4294967168 }
 0x151   :  { %373 = vsyncpa [#allocation3], 1 }
 0x152   :  { %374 = vsyncpa [#allocation6], 1 }
 0x153   :  { %375 = vsyncpa [#allocation9], 1 }
 0x154   :  { %376 = vsyncpa [#allocation4], 1 }

</bundles_post_ra>
